<compile_context>
chip_gen: v7x
topology: tpu7x:2x2x1
jax: 0.10.0
libtpu: 0.0.40
codegen_flags: <defaults>
</compile_context>

<pallas_src>
import functools

import jax
import jax.numpy as jnp
from jax.experimental import pallas as pl
from jax.experimental.pallas import tpu as pltpu


def _fused_conv_kernel(x_ref, w_ref, b_ref, o_ref, *, k, wp, lp):
    """One batch image per grid step (stride-1 conv over the padded input).

    x_ref: (1, C, Hp*Wp) bf16 -- zero-padded image, channel-major, flat spatial
    w_ref: (k*k, O, C)   bf16 -- w_ref[kh*k + kw, o, c] = weight[o, c, kh, kw]
    b_ref: (O, 1)        f32  -- bias column (zeros when bias=False)
    o_ref: (1, O, lp)    f32  -- lp = out_h1 * Wp  (rows over the padded width)
    """
    acc = None
    for kh in range(k):
        for kw in range(k):
            # For flat output position m = r*Wp + w this view reads
            # x_pad[c, r + kh, w + kw]  (columns w >= out_w are garbage and
            # are sliced away in the wrapper).
            v = x_ref[0, :, pl.ds(kh * wp + kw, lp)]                 # (C, lp)
            wk = w_ref[kh * k + kw, :, :]                            # (O, C)
            d = jnp.dot(wk, v, preferred_element_type=jnp.float32)   # (O, lp)
            acc = d if acc is None else acc + d
    o_ref[0, :, :] = acc + b_ref[...]                                # + bias


class MyConv2dPallas:
    """Pallas TPU equivalent of the PyTorch MyConv2d (im2col conv) module."""

    def __init__(self, in_channels, out_channels, kernel_size=3, stride=1,
                 padding=1, bias=True, key=None):
        self.in_channels = in_channels
        self.out_channels = out_channels
        self.kernel_size = kernel_size
        self.stride = stride
        self.padding = padding
        self.bias_flag = bias
        if key is None:
            key = jax.random.PRNGKey(42)
        # torch.randn(O, C, k, k) * 0.01
        self.weight = (
            jax.random.normal(
                key, (out_channels, in_channels, kernel_size, kernel_size),
                dtype=jnp.float32) * 0.01)
        self.bias = jnp.zeros((out_channels,), jnp.float32) if bias else None

    @functools.partial(jax.jit, static_argnums=0)
    def __call__(self, x):
        B, C, H, W = x.shape
        k, s, p = self.kernel_size, self.stride, self.padding
        O = self.out_channels

        out_h1 = H + 2 * p - k + 1            # stride-1 output height
        out_w1 = W + 2 * p - k + 1            # stride-1 output width
        out_h = (H + 2 * p - k) // s + 1      # requested (strided) output size
        out_w = (W + 2 * p - k) // s + 1

        wp = W + 2 * p                        # padded width
        hp = out_h1 + k                       # padded height (+ slack row so
                                              # the flat k*k shifted reads stay
                                              # in bounds)
        lp = out_h1 * wp                      # flat spatial size per out block

        # bf16 BEFORE padding/flattening; stays channel-major (no transpose).
        x_b = x.astype(jnp.bfloat16)
        x_b = jnp.pad(x_b, ((0, 0), (0, 0), (p, hp - H - p), (p, wp - W - p)))
        x_flat = x_b.reshape(B, C, hp * wp)

        # Weight -> (k*k, O, C), bias -> (O, 1); tiny, VMEM-resident.
        w_r = jnp.transpose(self.weight, (2, 3, 0, 1)).reshape(k * k, O, C)
        w_r = w_r.astype(jnp.bfloat16)
        bias = (self.bias if self.bias is not None
                else jnp.zeros((O,), jnp.float32))
        b_col = bias.reshape(O, 1).astype(jnp.float32)

        kernel = functools.partial(_fused_conv_kernel, k=k, wp=wp, lp=lp)

        # Rough per-step VMEM footprint (x image + weight + bias + out block),
        # doubled for double buffering, capped below v7x's 64 MiB.
        blk_bytes = (C * hp * wp * 2 + k * k * O * C * 2 + O * 4 + O * lp * 4)
        vmem_limit = int(min(max(8 * 1024 * 1024, 4 * blk_bytes),
                             48 * 1024 * 1024))

        cost = pl.CostEstimate(
            flops=2 * B * k * k * O * C * lp,
            transcendentals=0,
            bytes_accessed=(B * C * hp * wp * 2 + k * k * O * C * 2 + O * 4
                            + B * O * lp * 4),
        )

        out_flat = pl.pallas_call(
            kernel,
            out_shape=jax.ShapeDtypeStruct((B, O, lp), jnp.float32),
            grid_spec=pltpu.PrefetchScalarGridSpec(
                num_scalar_prefetch=0,
                grid=(B,),
                in_specs=[
                    pl.BlockSpec((1, C, hp * wp), lambda b: (b, 0, 0)),
                    pl.BlockSpec((k * k, O, C), lambda b: (0, 0, 0)),
                    pl.BlockSpec((O, 1), lambda b: (0, 0)),
                ],
                out_specs=pl.BlockSpec((1, O, lp), lambda b: (b, 0, 0)),
            ),
            compiler_params=pltpu.CompilerParams(
                dimension_semantics=("parallel",),
                vmem_limit_bytes=vmem_limit,
            ),
            cost_estimate=cost,
        )(x_flat, w_r, b_col)

        # (B, O, out_h1*Wp) -> NCHW; reshape is free, slice drops the padded
        # garbage columns.  Stride > 1: subsample the exact stride-1 result.
        out = out_flat.reshape(B, O, out_h1, wp)[:, :, :, :out_w1]
        if s > 1:
            out = out[:, :, ::s, ::s]
        return out[:, :, :out_h, :out_w]


if __name__ == "__main__":
    key = jax.random.PRNGKey(0)
    k_x, k_w = jax.random.split(key)

    B, C, H, W = 2, 4, 16, 16
    O = 8
    x = jax.random.normal(k_x, (B, C, H, W), dtype=jnp.float32)

    conv = MyConv2dPallas(C, O, kernel_size=3, stride=1, padding=1,
                          bias=True, key=k_w)
    out = jax.block_until_ready(conv(x))
    assert out.shape == (B, O, H, W), out.shape

    # Sanity check against XLA's native conv (bf16 inputs inside the kernel
    # => relaxed tolerance).
    ref = jax.lax.conv_general_dilated(
        x, conv.weight, window_strides=(1, 1), padding=((1, 1), (1, 1)),
        dimension_numbers=("NCHW", "OIHW", "NCHW"))
    ref = ref + conv.bias.reshape(1, O, 1, 1)
    max_err = float(jnp.max(jnp.abs(out - ref)))
    assert jnp.allclose(out, ref, atol=1e-2, rtol=1e-2), max_err

    print("KERNEL_OK")
</pallas_src>

<mosaic_0001>
module attributes {stable_mosaic.version = 11 : i64} {
  func.func @_fused_conv_kernel(%arg0: i32, %arg1: memref<1x4x342xbf16, #tpu.memory_space<vmem>>, %arg2: memref<9x8x4xbf16, #tpu.memory_space<vmem>>, %arg3: memref<8x1xf32, #tpu.memory_space<vmem>>, %arg4: memref<1x8x288xf32, #tpu.memory_space<vmem>>) attributes {dimension_semantics = [#tpu.dimension_semantics<parallel>], iteration_bounds = array<i64: 2>, scalar_prefetch = 0 : i64, scratch_operands = 0 : i64, tpu.core_type = #tpu.core_type<tc>, window_params = [{transform_indices = @transform_0, window_bounds = array<i64: 1, 4, 342>}, {pipeline_mode = #tpu.pipeline_mode<synchronous>, transform_indices = @transform_1, window_bounds = array<i64: 9, 8, 4>}, {pipeline_mode = #tpu.pipeline_mode<synchronous>, transform_indices = @transform_2, window_bounds = array<i64: 8, 1>}, {transform_indices = @transform_3, window_bounds = array<i64: 1, 8, 288>}]} {
    %c0 = arith.constant 0 : index
    %c0_0 = arith.constant 0 : index
    %c0_1 = arith.constant 0 : index
    %0 = vector.load %arg1[%c0, %c0_0, %c0_1] : memref<1x4x342xbf16, #tpu.memory_space<vmem>>, vector<1x4x288xbf16>
    %1 = vector.shape_cast %0 : vector<1x4x288xbf16> to vector<4x288xbf16>
    %c0_2 = arith.constant 0 : index
    %c0_3 = arith.constant 0 : index
    %c0_4 = arith.constant 0 : index
    %2 = vector.load %arg2[%c0_2, %c0_3, %c0_4] : memref<9x8x4xbf16, #tpu.memory_space<vmem>>, vector<1x8x4xbf16>
    %3 = vector.shape_cast %2 : vector<1x8x4xbf16> to vector<8x4xbf16>
    %cst = arith.constant dense<0.000000e+00> : vector<8x288xf32>
    %4 = tpu.matmul %3, %1, %cst {dimension_numbers = #tpu.dot_dimension_numbers<[1], [0], [0], [1], [0, 0, 1, 1], [], []>} : vector<8x4xbf16>, vector<4x288xbf16>, vector<8x288xf32> -> vector<8x288xf32>
    %c0_5 = arith.constant 0 : index
    %c0_6 = arith.constant 0 : index
    %c1 = arith.constant 1 : index
    %5 = vector.load %arg1[%c0_5, %c0_6, %c1] : memref<1x4x342xbf16, #tpu.memory_space<vmem>>, vector<1x4x288xbf16>
    %6 = vector.shape_cast %5 : vector<1x4x288xbf16> to vector<4x288xbf16>
    %c1_7 = arith.constant 1 : index
    %c0_8 = arith.constant 0 : index
    %c0_9 = arith.constant 0 : index
    %7 = vector.load %arg2[%c1_7, %c0_8, %c0_9] : memref<9x8x4xbf16, #tpu.memory_space<vmem>>, vector<1x8x4xbf16>
    %8 = vector.shape_cast %7 : vector<1x8x4xbf16> to vector<8x4xbf16>
    %cst_10 = arith.constant dense<0.000000e+00> : vector<8x288xf32>
    %9 = tpu.matmul %8, %6, %cst_10 {dimension_numbers = #tpu.dot_dimension_numbers<[1], [0], [0], [1], [0, 0, 1, 1], [], []>} : vector<8x4xbf16>, vector<4x288xbf16>, vector<8x288xf32> -> vector<8x288xf32>
    %10 = arith.addf %4, %9 : vector<8x288xf32>
    %c0_11 = arith.constant 0 : index
    %c0_12 = arith.constant 0 : index
    %c2 = arith.constant 2 : index
    %11 = vector.load %arg1[%c0_11, %c0_12, %c2] : memref<1x4x342xbf16, #tpu.memory_space<vmem>>, vector<1x4x288xbf16>
    %12 = vector.shape_cast %11 : vector<1x4x288xbf16> to vector<4x288xbf16>
    %c2_13 = arith.constant 2 : index
    %c0_14 = arith.constant 0 : index
    %c0_15 = arith.constant 0 : index
    %13 = vector.load %arg2[%c2_13, %c0_14, %c0_15] : memref<9x8x4xbf16, #tpu.memory_space<vmem>>, vector<1x8x4xbf16>
    %14 = vector.shape_cast %13 : vector<1x8x4xbf16> to vector<8x4xbf16>
    %cst_16 = arith.constant dense<0.000000e+00> : vector<8x288xf32>
    %15 = tpu.matmul %14, %12, %cst_16 {dimension_numbers = #tpu.dot_dimension_numbers<[1], [0], [0], [1], [0, 0, 1, 1], [], []>} : vector<8x4xbf16>, vector<4x288xbf16>, vector<8x288xf32> -> vector<8x288xf32>
    %16 = arith.addf %10, %15 : vector<8x288xf32>
    %c0_17 = arith.constant 0 : index
    %c0_18 = arith.constant 0 : index
    %c18 = arith.constant 18 : index
    %17 = vector.load %arg1[%c0_17, %c0_18, %c18] : memref<1x4x342xbf16, #tpu.memory_space<vmem>>, vector<1x4x288xbf16>
    %18 = vector.shape_cast %17 : vector<1x4x288xbf16> to vector<4x288xbf16>
    %c3 = arith.constant 3 : index
    %c0_19 = arith.constant 0 : index
    %c0_20 = arith.constant 0 : index
    %19 = vector.load %arg2[%c3, %c0_19, %c0_20] : memref<9x8x4xbf16, #tpu.memory_space<vmem>>, vector<1x8x4xbf16>
    %20 = vector.shape_cast %19 : vector<1x8x4xbf16> to vector<8x4xbf16>
    %cst_21 = arith.constant dense<0.000000e+00> : vector<8x288xf32>
    %21 = tpu.matmul %20, %18, %cst_21 {dimension_numbers = #tpu.dot_dimension_numbers<[1], [0], [0], [1], [0, 0, 1, 1], [], []>} : vector<8x4xbf16>, vector<4x288xbf16>, vector<8x288xf32> -> vector<8x288xf32>
    %22 = arith.addf %16, %21 : vector<8x288xf32>
    %c0_22 = arith.constant 0 : index
    %c0_23 = arith.constant 0 : index
    %c19 = arith.constant 19 : index
    %23 = vector.load %arg1[%c0_22, %c0_23, %c19] : memref<1x4x342xbf16, #tpu.memory_space<vmem>>, vector<1x4x288xbf16>
    %24 = vector.shape_cast %23 : vector<1x4x288xbf16> to vector<4x288xbf16>
    %c4 = arith.constant 4 : index
    %c0_24 = arith.constant 0 : index
    %c0_25 = arith.constant 0 : index
    %25 = vector.load %arg2[%c4, %c0_24, %c0_25] : memref<9x8x4xbf16, #tpu.memory_space<vmem>>, vector<1x8x4xbf16>
    %26 = vector.shape_cast %25 : vector<1x8x4xbf16> to vector<8x4xbf16>
    %cst_26 = arith.constant dense<0.000000e+00> : vector<8x288xf32>
    %27 = tpu.matmul %26, %24, %cst_26 {dimension_numbers = #tpu.dot_dimension_numbers<[1], [0], [0], [1], [0, 0, 1, 1], [], []>} : vector<8x4xbf16>, vector<4x288xbf16>, vector<8x288xf32> -> vector<8x288xf32>
    %28 = arith.addf %22, %27 : vector<8x288xf32>
    %c0_27 = arith.constant 0 : index
    %c0_28 = arith.constant 0 : index
    %c20 = arith.constant 20 : index
    %29 = vector.load %arg1[%c0_27, %c0_28, %c20] : memref<1x4x342xbf16, #tpu.memory_space<vmem>>, vector<1x4x288xbf16>
    %30 = vector.shape_cast %29 : vector<1x4x288xbf16> to vector<4x288xbf16>
    %c5 = arith.constant 5 : index
    %c0_29 = arith.constant 0 : index
    %c0_30 = arith.constant 0 : index
    %31 = vector.load %arg2[%c5, %c0_29, %c0_30] : memref<9x8x4xbf16, #tpu.memory_space<vmem>>, vector<1x8x4xbf16>
    %32 = vector.shape_cast %31 : vector<1x8x4xbf16> to vector<8x4xbf16>
    %cst_31 = arith.constant dense<0.000000e+00> : vector<8x288xf32>
    %33 = tpu.matmul %32, %30, %cst_31 {dimension_numbers = #tpu.dot_dimension_numbers<[1], [0], [0], [1], [0, 0, 1, 1], [], []>} : vector<8x4xbf16>, vector<4x288xbf16>, vector<8x288xf32> -> vector<8x288xf32>
    %34 = arith.addf %28, %33 : vector<8x288xf32>
    %c0_32 = arith.constant 0 : index
    %c0_33 = arith.constant 0 : index
    %c36 = arith.constant 36 : index
    %35 = vector.load %arg1[%c0_32, %c0_33, %c36] : memref<1x4x342xbf16, #tpu.memory_space<vmem>>, vector<1x4x288xbf16>
    %36 = vector.shape_cast %35 : vector<1x4x288xbf16> to vector<4x288xbf16>
    %c6 = arith.constant 6 : index
    %c0_34 = arith.constant 0 : index
    %c0_35 = arith.constant 0 : index
    %37 = vector.load %arg2[%c6, %c0_34, %c0_35] : memref<9x8x4xbf16, #tpu.memory_space<vmem>>, vector<1x8x4xbf16>
    %38 = vector.shape_cast %37 : vector<1x8x4xbf16> to vector<8x4xbf16>
    %cst_36 = arith.constant dense<0.000000e+00> : vector<8x288xf32>
    %39 = tpu.matmul %38, %36, %cst_36 {dimension_numbers = #tpu.dot_dimension_numbers<[1], [0], [0], [1], [0, 0, 1, 1], [], []>} : vector<8x4xbf16>, vector<4x288xbf16>, vector<8x288xf32> -> vector<8x288xf32>
    %40 = arith.addf %34, %39 : vector<8x288xf32>
    %c0_37 = arith.constant 0 : index
    %c0_38 = arith.constant 0 : index
    %c37 = arith.constant 37 : index
    %41 = vector.load %arg1[%c0_37, %c0_38, %c37] : memref<1x4x342xbf16, #tpu.memory_space<vmem>>, vector<1x4x288xbf16>
    %42 = vector.shape_cast %41 : vector<1x4x288xbf16> to vector<4x288xbf16>
    %c7 = arith.constant 7 : index
    %c0_39 = arith.constant 0 : index
    %c0_40 = arith.constant 0 : index
    %43 = vector.load %arg2[%c7, %c0_39, %c0_40] : memref<9x8x4xbf16, #tpu.memory_space<vmem>>, vector<1x8x4xbf16>
    %44 = vector.shape_cast %43 : vector<1x8x4xbf16> to vector<8x4xbf16>
    %cst_41 = arith.constant dense<0.000000e+00> : vector<8x288xf32>
    %45 = tpu.matmul %44, %42, %cst_41 {dimension_numbers = #tpu.dot_dimension_numbers<[1], [0], [0], [1], [0, 0, 1, 1], [], []>} : vector<8x4xbf16>, vector<4x288xbf16>, vector<8x288xf32> -> vector<8x288xf32>
    %46 = arith.addf %40, %45 : vector<8x288xf32>
    %c0_42 = arith.constant 0 : index
    %c0_43 = arith.constant 0 : index
    %c38 = arith.constant 38 : index
    %47 = vector.load %arg1[%c0_42, %c0_43, %c38] : memref<1x4x342xbf16, #tpu.memory_space<vmem>>, vector<1x4x288xbf16>
    %48 = vector.shape_cast %47 : vector<1x4x288xbf16> to vector<4x288xbf16>
    %c8 = arith.constant 8 : index
    %c0_44 = arith.constant 0 : index
    %c0_45 = arith.constant 0 : index
    %49 = vector.load %arg2[%c8, %c0_44, %c0_45] : memref<9x8x4xbf16, #tpu.memory_space<vmem>>, vector<1x8x4xbf16>
    %50 = vector.shape_cast %49 : vector<1x8x4xbf16> to vector<8x4xbf16>
    %cst_46 = arith.constant dense<0.000000e+00> : vector<8x288xf32>
    %51 = tpu.matmul %50, %48, %cst_46 {dimension_numbers = #tpu.dot_dimension_numbers<[1], [0], [0], [1], [0, 0, 1, 1], [], []>} : vector<8x4xbf16>, vector<4x288xbf16>, vector<8x288xf32> -> vector<8x288xf32>
    %52 = arith.addf %46, %51 : vector<8x288xf32>
    %c0_47 = arith.constant 0 : index
    %c0_48 = arith.constant 0 : index
    %53 = vector.load %arg3[%c0_47, %c0_48] : memref<8x1xf32, #tpu.memory_space<vmem>>, vector<8x1xf32>
    %54 = vector.broadcast %53 : vector<8x1xf32> to vector<8x288xf32>
    %55 = arith.addf %52, %54 : vector<8x288xf32>
    %c0_49 = arith.constant 0 : index
    %c0_50 = arith.constant 0 : index
    %c0_51 = arith.constant 0 : index
    %56 = vector.load %arg4[%c0_49, %c0_50, %c0_51] : memref<1x8x288xf32, #tpu.memory_space<vmem>>, vector<1x8x288xf32>
    %57 = vector.shape_cast %56 : vector<1x8x288xf32> to vector<8x288xf32>
    %58 = vector.shape_cast %55 : vector<8x288xf32> to vector<1x8x288xf32>
    tpu.vector_store %arg4[%c0_49, %c0_50, %c0_51], %58 {strides = array<i32>} : memref<1x8x288xf32, #tpu.memory_space<vmem>>, vector<1x8x288xf32>,
    return
  }
  func.func @transform_0(%arg0: i32) -> (i32, i32, i32) {
    %c0_i32 = arith.constant 0 : i32
    %c0_i32_0 = arith.constant 0 : i32
    %c0_i32_1 = arith.constant 0 : i32
    return %arg0, %c0_i32, %c0_i32_0 : i32, i32, i32
  }
  func.func @transform_1(%arg0: i32) -> (i32, i32, i32) {
    %c0_i32 = arith.constant 0 : i32
    %c0_i32_0 = arith.constant 0 : i32
    %c0_i32_1 = arith.constant 0 : i32
    %c0_i32_2 = arith.constant 0 : i32
    return %c0_i32, %c0_i32_0, %c0_i32_1 : i32, i32, i32
  }
  func.func @transform_2(%arg0: i32) -> (i32, i32) {
    %c0_i32 = arith.constant 0 : i32
    %c0_i32_0 = arith.constant 0 : i32
    %c0_i32_1 = arith.constant 0 : i32
    return %c0_i32, %c0_i32_0 : i32, i32
  }
  func.func @transform_3(%arg0: i32) -> (i32, i32, i32) {
    %c0_i32 = arith.constant 0 : i32
    %c0_i32_0 = arith.constant 0 : i32
    %c0_i32_1 = arith.constant 0 : i32
    return %arg0, %c0_i32, %c0_i32_0 : i32, i32, i32
  }
}

</mosaic_0001>

<bundles_post_ra>
// kernel: a_call__.1
= control target key start
LH: loop header
LB: loop body
LE: loop exit
PB: predicated region body
PF: predicated region fallthrough
CT: control target
= control target key end

     0   :  { %s1520_s12 = smov 0   ;;  %s1697_s0 = inlined_call_operand.vmem [shape: bf16[2,4,342], index: 0, kind: input, shape index: {}]   ;;  %s1698_s1 = inlined_call_operand.vmem [shape: bf16[9,8,4], index: 1, kind: input, shape index: {}]   ;;  %s1699_s2 = inlined_call_operand.vmem [shape: f32[8,1], index: 2, kind: input, shape index: {}]   ;;  %s1700_s3 = inlined_call_operand.vmem [shape: f32[2,8,288], index: 3, kind: output, shape index: {}]  }
   0x1 LB: > { %s1333_s13 = sadd.s32 4294967295, %s1486_s12   ;;  %p1337_p0 = scmp.ge.s32.totalorder %s1486_s12, 1  ;;  %s1486_s12 = sphi %s1520_s12, %s13_s12  }
   0x2   : > { %p137_p1 = scmp.lt.s32.totalorder %s1486_s12, 3 }
   0x4   : > { %p138_p2 = pnand %p1337_p0, %p137_p1 }
   0x5   : > { %p161_p3 = scmp.lt.s32.totalorder (!%p138_p2), %s1333_s13, 1  ;;  %v181_v0 = vlaneseq (!%p138_p2)  ;;  %v1488_v1 = vmov (!%p138_p2), 1983009808   ;;  %v1489_v3 = vmov (!%p138_p2), 0.0   ;;  %vm1490_vm0 = vmmov (!%p138_p2), 0   ;;  %s1492_s18 = smov (!%p138_p2), 127  }
   0x6   : > { %141 = sbr.rel (%p138_p2) target bundleno = 426 (0x1aa), region = 32  ;;  %v179_v2 = vunpack.c.l.s4 (!%p138_p2), %v1488_v1  ;;  %1395 = vmatprep.subr.bf16.mxu1 (!%p138_p2), %v1489_v3  ;;  %1397 = vmatprep.mubr.msk.bf16.mxu1 (!%p138_p2), %vm1490_vm0, %v1489_v3  ;;  %v1491_v6 = vmov (!%p138_p2), 0   ;;  %s1493_s19 = smov (!%p138_p2), 126   ;;  %v1265_v48 = vld [vmem:[%s1699_s2] sm:$0xff] (!%p138_p2)  ;;  %vm206_vm1 = vcmask (!%p138_p2), 1041408   ;;  %vm199_vm2 = vcmask (!%p138_p2), 1039360  }
   0x7   : > { %v182_v4 = vshrl.u32 (!%p138_p2), %v181_v0, 7  ;;  %248 = vmatprep.mubr.bf16.mxu0 (!%p138_p2), %v1491_v6  ;;  %1471 = vset.pattern.permute.xlu0 (!%p138_p2), %v1491_v6  ;;  %s1494_s20 = smov (!%p138_p2), 110   ;;  %s1495_s21 = smov (!%p138_p2), 109   ;;  %v1340_v53 = vld [vmem:[%s1698_s1 + $0x4] sm:$0xf] (!%p138_p2)  ;;  %vm202_vm3 = vcmask (!%p138_p2), 31744  }
   0x8   : > { %v180_v5 = vunpack.c.0.s8 (!%p138_p2), %v179_v2  ;;  %s1496_s22 = smov (!%p138_p2), 108   ;;  %s1497_s23 = smov (!%p138_p2), 92   ;;  %vm416_vm4 = vcmask (!%p138_p2), 1031168   ;;  %v173_v63 = vld [vmem:[%s1698_s1] sm:$0xf] (!%p138_p2)  ;;  %vm541_vm5 = vcmask (!%p138_p2), 900096  }
   0x9   : > { %s1498_s24 = smov (!%p138_p2), 91   ;;  %s1499_s25 = smov (!%p138_p2), 90   ;;  %vm666_vm6 = vcmask (!%p138_p2), 891904   ;;  %vm791_vm7 = vcmask (!%p138_p2), 883712   ;;  %vm916_vm8 = vcmask (!%p138_p2), 752640   ;;  %vm1041_vm9 = vcmask (!%p138_p2), 744448  }
   0xa   : > { %v1536_v7 = vsub.s32 (!%p138_p2), %v180_v5, %v182_v4  ;;  %vm1166_vm10 = vcmask (!%p138_p2), 736256   ;;  %vm1276_vm11 = vcmask (!%p138_p2), 261120  }
   0xd   : > { %s1702_s13 = smov (!%p161_p3, %s1333_s13), 1 }
   0xe   : > { %s1449_s14 = smul.u32 6, %s1702_s13 }
  0x10   : > { %s1541_s17 = scalar_lea.vmem %s1697_s0, %s1449_s14 }
  0x11   : > { %v172_v8 = vld [vmem:[%s1541_s17] sm:$0x3f] }
  0x12   : > { %v1545_v9 = vrot.slane %v172_v8, %v1536_v7  ;;  %v177_v10 = vcombine.high %v172_v8, %v172_v8  ;;  %v390_v11 = vld [vmem:[%s1541_s17] sm:$0x3f] }
  0x13   : > { %v401_v14 = vrot.slane %v390_v11, %v1536_v7  ;;  %v394_v15 = vcombine.high %v390_v11, %v390_v11  ;;  %v515_v17 = vld [vmem:[%s1541_s17] sm:$0x3f] }
  0x14   : > { %193 = vrot.lane.b32.xlu0 %v1545_v9, %s1492_s18  ;;  %v1550_v12 = vrot.slane %v177_v10, %v1536_v7  ;;  %v1554_v13 = vcombine.high %v1545_v9, %v1545_v9  ;;  %v526_v19 = vrot.slane %v515_v17, %v1536_v7  ;;  %v519_v20 = vcombine.high %v515_v17, %v515_v17  ;;  %v640_v22 = vld [vmem:[%s1541_s17] sm:$0x3f]  ;;  %v1347_v10 = vld [vmem:[%s1698_s1 + $0x8] sm:$0xf] }
  0x15   : > { %v409_v16 = vcombine.high %v401_v14, %v401_v14  ;;  %v408_v18 = vrot.slane %v394_v15, %v1536_v7  ;;  %v651_v24 = vrot.slane %v640_v22, %v1536_v7  ;;  %v644_v25 = vcombine.high %v640_v22, %v640_v22  ;;  %v765_v27 = vld [vmem:[%s1541_s17] sm:$0x3f] }
  0x16   : > { %197 = vrot.lane.b32.xlu1 %v1550_v12, %s1492_s18  ;;  %v534_v21 = vcombine.high %v526_v19, %v526_v19  ;;  %v533_v23 = vrot.slane %v519_v20, %v1536_v7  ;;  %v776_v29 = vrot.slane %v765_v27, %v1536_v7  ;;  %v769_v30 = vcombine.high %v765_v27, %v765_v27  ;;  %v890_v32 = vld [vmem:[%s1541_s17] sm:$0x3f]  ;;  %v1355_v27 = vld [vmem:[%s1698_s1 + $0x10] sm:$0xf] }
  0x17   : > { %v659_v26 = vcombine.high %v651_v24, %v651_v24  ;;  %v658_v28 = vrot.slane %v644_v25, %v1536_v7  ;;  %v901_v34 = vrot.slane %v890_v32, %v1536_v7  ;;  %v894_v35 = vcombine.high %v890_v32, %v890_v32  ;;  %v1015_v37 = vld [vmem:[%s1541_s17] sm:$0x3f] }
  0x18   : > { %195 = vrot.lane.b32.xlu0 %v1554_v13, %s1492_s18  ;;  %v784_v31 = vcombine.high %v776_v29, %v776_v29  ;;  %v783_v33 = vrot.slane %v769_v30, %v1536_v7  ;;  %v1026_v39 = vrot.slane %v1015_v37, %v1536_v7  ;;  %v1019_v40 = vcombine.high %v1015_v37, %v1015_v37  ;;  %v1140_v42 = vld [vmem:[%s1541_s17] sm:$0x3f] }
  0x19   : > { %v909_v36 = vcombine.high %v901_v34, %v901_v34  ;;  %v908_v38 = vrot.slane %v894_v35, %v1536_v7  ;;  %v1151_v44 = vrot.slane %v1140_v42, %v1536_v7  ;;  %v1144_v45 = vcombine.high %v1140_v42, %v1140_v42  ;;  %v1359_v35 = vld [vmem:[%s1698_s1 + $0x14] sm:$0xf]  ;;  %v1363_v42 = vld [vmem:[%s1698_s1 + $0x18] sm:$0xf] }
  0x1a   : > { %410 = vrot.lane.b32.xlu1 %v401_v14, %s1493_s19  ;;  %v1034_v41 = vcombine.high %v1026_v39, %v1026_v39  ;;  %v1033_v43 = vrot.slane %v1019_v40, %v1536_v7  ;;  %v307_v56 = vsel %vm206_vm1, %v1550_v12, 0  ;;  %v301_v59 = vsel %vm206_vm1, %v1545_v9, 0 }
  0x1b   : > { %v1159_v46 = vcombine.high %v1151_v44, %v1151_v44  ;;  %v1158_v47 = vrot.slane %v1144_v45, %v1536_v7 }
  0x1c   : > { %412 = vrot.lane.b32.xlu0 %v409_v16, %s1493_s19 }
  0x1e   : > { %414 = vrot.lane.b32.xlu1 %v408_v18, %s1493_s19 }
  0x20   : > { %535 = vrot.lane.b32.xlu0 %v526_v19, %s1494_s20  ;;  %v1351_v19 = vld [vmem:[%s1698_s1 + $0xc] sm:$0xf] }
  0x22   : > { %537 = vrot.lane.b32.xlu1 %v534_v21, %s1494_s20 }
  0x24   : > { %539 = vrot.lane.b32.xlu0 %v533_v23, %s1494_s20 }
  0x26   : > { %660 = vrot.lane.b32.xlu1 %v651_v24, %s1495_s21 }
  0x28   : > { %662 = vrot.lane.b32.xlu0 %v659_v26, %s1495_s21 }
  0x2a   : > { %664 = vrot.lane.b32.xlu1 %v658_v28, %s1495_s21  ;;  %s1450_s21 = smul.u32 24, %s1702_s13 }
  0x2c   : > { %785 = vrot.lane.b32.xlu0 %v776_v29, %s1496_s22 }
  0x2e   : > { %787 = vrot.lane.b32.xlu1 %v784_v31, %s1496_s22 }
  0x30   : > { %789 = vrot.lane.b32.xlu0 %v783_v33, %s1496_s22 }
  0x32   : > { %910 = vrot.lane.b32.xlu1 %v901_v34, %s1497_s23 }
  0x34   : > { %912 = vrot.lane.b32.xlu0 %v909_v36, %s1497_s23 }
  0x36   : > { %914 = vrot.lane.b32.xlu1 %v908_v38, %s1497_s23 }
  0x38   : > { %1035 = vrot.lane.b32.xlu0 %v1026_v39, %s1498_s24 }
  0x3a   : > { %1037 = vrot.lane.b32.xlu1 %v1034_v41, %s1498_s24 }
  0x3c   : > { %1039 = vrot.lane.b32.xlu0 %v1033_v43, %s1498_s24  ;;  %s170_s24 = scalar_lea.vmem %s1700_s3, %s1450_s21 }
  0x3e   : > { %1160 = vrot.lane.b32.xlu1 %v1151_v44, %s1499_s25 }
  0x40   : > { %1162 = vrot.lane.b32.xlu0 %v1159_v46, %s1499_s25 }
  0x42   : > { %1164 = vrot.lane.b32.xlu1 %v1158_v47, %s1499_s25 }
  0x44   : > { %1268 = vperm.xlu0 %1471, %v1265_v48  }
  0x86   : > { %v194_v49 = vpop.permute.xlu0 %193 }
  0x88   : > { %v198_v50 = vpop.permute.xlu1 %197 }
  0x89   : > { %v214_v51 = vsel %vm206_vm1, %v198_v50, 0 }
  0x8a   : > { %v196_v52 = vpop.permute.xlu0 %195  ;;  %1396 = vmatpush3.bf16.msra.mxu1 %v214_v51 }
  0x8b   : > { %v201_v54 = vsel %vm199_vm2, %v196_v52, %v198_v50  ;;  %v200_v55 = vsel %vm199_vm2, %v194_v49, %v196_v52  ;;  %1401 = vmatprep.subr.bf16.mxu1 %v1489_v3  ;;  %v1367_v49 = vld [vmem:[%s1698_s1 + $0x1c] sm:$0xf] }
  0x8c   : > { %1341 = vmatprep.subr.msk.bf16.mxu0 %vm206_vm1, %v201_v54  ;;  %v208_v57 = vsel %vm206_vm1, %v200_v55, 0  ;;  %v411_v58 = vpop.permute.xlu1 %410 }
  0x8d   : > { %217 = vmatpush1.bf16.msra.mxu0 %v208_v57  ;;  %1398 = vmatmul.mubr.msk.bf16.vlgmr.msra.gmra.mrb[0].mxu1 %vm202_vm3, %v1340_v53 }
  0x8e   : > { %1344 = vmatprep.subr.msk.bf16.mxu0 %vm206_vm1, %v1554_v13  ;;  %v413_v60 = vpop.permute.xlu0 %412  ;;  %1402 = vmatpush3.bf16.msra.mxu1 %v307_v56 }
  0x8f   : > { %1403 = vmatprep.mubr.msk.bf16.mxu1 %vm1490_vm0, %v1489_v3  ;;  %1407 = vmatprep.subr.bf16.mxu1 %v1489_v3  ;;  %v417_v1 = vsel %vm416_vm4, %v411_v58, %v413_v60 }
  0x90   : > { %1342 = vmatmul.mubr.msk.bf16.vlgmr.msra.gmra.mrb[0].mxu0 %vm202_vm3, %v1340_v53  ;;  %v415_v61 = vpop.permute.xlu1 %414  ;;  %v423_v5 = vsel %vm206_vm1, %v417_v1, 0  ;;  %v1371_v53 = vld [vmem:[%s1698_s1 + $0x20] sm:$0xf] }
  0x91   : > { %310 = vmatpush1.bf16.msra.mxu0 %v301_v59  ;;  %v418_v62 = vsel %vm416_vm4, %v413_v60, %v415_v61  ;;  %341 = vmatprep.mubr.bf16.mxu0 %v1491_v6  ;;  %v429_v2 = vsel %vm206_vm1, %v415_v61, 0 }
  0x92   : > { %1348 = vmatprep.subr.msk.bf16.mxu0 %vm206_vm1, %v418_v62  ;;  %v536_v0 = vpop.permute.xlu0 %535 }
  0x94   : > { %v538_v4 = vpop.permute.xlu1 %537 }
  0x95   : > { %1404 = vmatmul.mubr.msk.bf16.vlgmr.msra.gmra.mrb[4].mxu1 %vm202_vm3, %v173_v63  ;;  %v542_v12 = vsel %vm541_vm5, %v536_v0, %v538_v4 }
  0x96   : > { %1408 = vmatpush3.bf16.msra.mxu1 %v429_v2  ;;  %1409 = vmatprep.mubr.msk.bf16.mxu1 %vm1490_vm0, %v1489_v3  ;;  %v540_v7 = vpop.permute.xlu0 %539  ;;  %v548_v15 = vsel %vm206_vm1, %v542_v12, 0 }
  0x97   : > { %v543_v8 = vsel %vm541_vm5, %v538_v4, %v540_v7  ;;  %1413 = vmatprep.subr.bf16.mxu1 %v1489_v3  ;;  %v554_v13 = vsel %vm206_vm1, %v540_v7, 0 }
  0x98   : > { %1345 = vmatmul.mubr.msk.bf16.vlgmr.msra.gmra.mrb[4].mxu0 %vm202_vm3, %v173_v63  ;;  %v661_v9 = vpop.permute.xlu1 %660 }
  0x99   : > { %432 = vmatpush1.bf16.msra.mxu0 %v423_v5  ;;  %463 = vmatprep.mubr.bf16.mxu0 %v1491_v6 }
  0x9a   : > { %1352 = vmatprep.subr.msk.bf16.mxu0 %vm206_vm1, %v543_v8  ;;  %v663_v11 = vpop.permute.xlu0 %662 }
  0x9b   : > { %v667_v20 = vsel %vm666_vm6, %v661_v9, %v663_v11 }
  0x9c   : > { %v665_v14 = vpop.permute.xlu1 %664  ;;  %v673_v23 = vsel %vm206_vm1, %v667_v20, 0 }
  0x9d   : > { %1410 = vmatmul.mubr.msk.bf16.vlgmr.msra.gmra.mrb[8].mxu1 %vm202_vm3, %v1347_v10  ;;  %v668_v17 = vsel %vm666_vm6, %v663_v11, %v665_v14  ;;  %v679_v21 = vsel %vm206_vm1, %v665_v14, 0 }
  0x9e   : > { %1414 = vmatpush3.bf16.msra.mxu1 %v554_v13  ;;  %1415 = vmatprep.mubr.msk.bf16.mxu1 %vm1490_vm0, %v1489_v3  ;;  %v786_v16 = vpop.permute.xlu0 %785 }
  0x9f   : > { %1419 = vmatprep.subr.bf16.mxu1 %v1489_v3 }
  0xa0   : > { %1349 = vmatmul.mubr.msk.bf16.vlgmr.msra.gmra.mrb[8].mxu0 %vm202_vm3, %v1347_v10  ;;  %v788_v18 = vpop.permute.xlu1 %787 }
  0xa1   : > { %557 = vmatpush1.bf16.msra.mxu0 %v548_v15  ;;  %588 = vmatprep.mubr.bf16.mxu0 %v1491_v6  ;;  %v792_v28 = vsel %vm791_vm7, %v786_v16, %v788_v18 }
  0xa2   : > { %1356 = vmatprep.subr.msk.bf16.mxu0 %vm206_vm1, %v668_v17  ;;  %v790_v22 = vpop.permute.xlu0 %789  ;;  %v798_v31 = vsel %vm206_vm1, %v792_v28, 0 }
  0xa3   : > { %v793_v25 = vsel %vm791_vm7, %v788_v18, %v790_v22  ;;  %v804_v29 = vsel %vm206_vm1, %v790_v22, 0 }
  0xa4   : > { %v911_v24 = vpop.permute.xlu1 %910 }
  0xa5   : > { %1416 = vmatmul.mubr.msk.bf16.vlgmr.msra.gmra.mrb[12].mxu1 %vm202_vm3, %v1351_v19 }
  0xa6   : > { %1420 = vmatpush3.bf16.msra.mxu1 %v679_v21  ;;  %1421 = vmatprep.mubr.msk.bf16.mxu1 %vm1490_vm0, %v1489_v3  ;;  %v913_v26 = vpop.permute.xlu0 %912 }
  0xa7   : > { %1425 = vmatprep.subr.bf16.mxu1 %v1489_v3  ;;  %v917_v36 = vsel %vm916_vm8, %v911_v24, %v913_v26 }
  0xa8   : > { %1353 = vmatmul.mubr.msk.bf16.vlgmr.msra.gmra.mrb[12].mxu0 %vm202_vm3, %v1351_v19  ;;  %v915_v30 = vpop.permute.xlu1 %914  ;;  %v923_v39 = vsel %vm206_vm1, %v917_v36, 0 }
  0xa9   : > { %682 = vmatpush1.bf16.msra.mxu0 %v673_v23  ;;  %713 = vmatprep.mubr.bf16.mxu0 %v1491_v6  ;;  %v918_v33 = vsel %vm916_vm8, %v913_v26, %v915_v30  ;;  %v929_v37 = vsel %vm206_vm1, %v915_v30, 0 }
  0xaa   : > { %1360 = vmatprep.subr.msk.bf16.mxu0 %vm206_vm1, %v793_v25  ;;  %v1036_v32 = vpop.permute.xlu0 %1035 }
  0xac   : > { %v1038_v34 = vpop.permute.xlu1 %1037 }
  0xad   : > { %1422 = vmatmul.mubr.msk.bf16.vlgmr.msra.gmra.mrb[16].mxu1 %vm202_vm3, %v1355_v27  ;;  %v1042_v43 = vsel %vm1041_vm9, %v1036_v32, %v1038_v34 }
  0xae   : > { %1426 = vmatpush3.bf16.msra.mxu1 %v804_v29  ;;  %1427 = vmatprep.mubr.msk.bf16.mxu1 %vm1490_vm0, %v1489_v3  ;;  %v1040_v38 = vpop.permute.xlu0 %1039  ;;  %v1048_v47 = vsel %vm206_vm1, %v1042_v43, 0 }
  0xaf   : > { %1431 = vmatprep.subr.bf16.mxu1 %v1489_v3  ;;  %v1043_v41 = vsel %vm1041_vm9, %v1038_v34, %v1040_v38  ;;  %v1054_v44 = vsel %vm206_vm1, %v1040_v38, 0 }
  0xb0   : > { %1357 = vmatmul.mubr.msk.bf16.vlgmr.msra.gmra.mrb[16].mxu0 %vm202_vm3, %v1355_v27  ;;  %v1161_v40 = vpop.permute.xlu1 %1160 }
  0xb1   : > { %807 = vmatpush1.bf16.msra.mxu0 %v798_v31  ;;  %838 = vmatprep.mubr.bf16.mxu0 %v1491_v6 }
  0xb2   : > { %1364 = vmatprep.subr.msk.bf16.mxu0 %vm206_vm1, %v918_v33  ;;  %v1163_v45 = vpop.permute.xlu0 %1162 }
  0xb3   : > { %v1167_v50 = vsel %vm1166_vm10, %v1161_v40, %v1163_v45 }
  0xb4   : > { %v1165_v46 = vpop.permute.xlu1 %1164  ;;  %v1173_v52 = vsel %vm206_vm1, %v1167_v50, 0 }
  0xb5   : > { %1428 = vmatmul.mubr.msk.bf16.vlgmr.msra.gmra.mrb[20].mxu1 %vm202_vm3, %v1359_v35  ;;  %v1168_v48 = vsel %vm1166_vm10, %v1163_v45, %v1165_v46  ;;  %v1179_v51 = vsel %vm206_vm1, %v1165_v46, 0 }
  0xb6   : > { %1432 = vmatpush3.bf16.msra.mxu1 %v929_v37  ;;  %1433 = vmatprep.mubr.msk.bf16.mxu1 %vm1490_vm0, %v1489_v3 }
  0xb7   : > { %1437 = vmatprep.subr.bf16.mxu1 %v1489_v3 }
  0xb8   : > { %1361 = vmatmul.mubr.msk.bf16.vlgmr.msra.gmra.mrb[20].mxu0 %vm202_vm3, %v1359_v35 }
  0xb9   : > { %932 = vmatpush1.bf16.msra.mxu0 %v923_v39  ;;  %963 = vmatprep.mubr.bf16.mxu0 %v1491_v6 }
  0xba   : > { %1368 = vmatprep.subr.msk.bf16.mxu0 %vm206_vm1, %v1043_v41 }
  0xbd   : > { %1434 = vmatmul.mubr.msk.bf16.vlgmr.msra.gmra.mrb[24].mxu1 %vm202_vm3, %v1363_v42 }
  0xbe   : > { %1438 = vmatpush3.bf16.msra.mxu1 %v1054_v44  ;;  %1439 = vmatprep.mubr.msk.bf16.mxu1 %vm1490_vm0, %v1489_v3 }
  0xbf   : > { %1443 = vmatprep.subr.bf16.mxu1 %v1489_v3 }
  0xc0   : > { %1365 = vmatmul.mubr.msk.bf16.vlgmr.msra.gmra.mrb[24].mxu0 %vm202_vm3, %v1363_v42 }
  0xc1   : > { %1057 = vmatpush1.bf16.msra.mxu0 %v1048_v47  ;;  %1088 = vmatprep.mubr.bf16.mxu0 %v1491_v6 }
  0xc2   : > { %1372 = vmatprep.subr.msk.bf16.mxu0 %vm206_vm1, %v1168_v48 }
  0xc5   : > { %1440 = vmatmul.mubr.msk.bf16.vlgmr.msra.gmra.mrb[28].mxu1 %vm202_vm3, %v1367_v49 }
  0xc6   : > { %1444 = vmatpush3.bf16.msra.mxu1 %v1179_v51  ;;  %1445 = vmatprep.mubr.msk.bf16.mxu1 %vm1490_vm0, %v1489_v3 }
  0xc8   : > { %1369 = vmatmul.mubr.msk.bf16.vlgmr.msra.gmra.mrb[28].mxu0 %vm202_vm3, %v1367_v49 }
  0xc9   : > { %1182 = vmatpush1.bf16.msra.mxu0 %v1173_v52  ;;  %1213 = vmatprep.mubr.bf16.mxu0 %v1491_v6 }
  0xcd   : > { %1446 = vmatmul.mubr.msk.bf16.vlgmr.msra.gmra.mrb[32].mxu1 %vm202_vm3, %v1371_v53 }
  0xd0   : > { %1373 = vmatmul.mubr.msk.bf16.vlgmr.msra.gmra.mrb[32].mxu0 %vm202_vm3, %v1371_v53 }
 0x160   : > { %v291_v54 = vpop.f32.mrb[0].mxu1 }
 0x161   : > { %v1399_v55 = vpop.f32.mrb[1].mxu1 }
 0x162   : > { %v294_v56 = vpop.f32.mrb[2].mxu1 }
 0x163   : > { %v250_v57 = vpop.f32.mrb[0].mxu0  ;;  %v1400_v58 = vpop.f32.mrb[3].mxu1 }
 0x164   : > { %v252_v59 = vpop.f32.mrb[1].mxu0 }
 0x165   : > { %v254_v3 = vpop.f32.mrb[2].mxu0 }
 0x166   : > { %v255_v60 = vpop.f32.mrb[3].mxu0 }
 0x168   : > { %v384_v61 = vpop.f32.mrb[4].mxu1 }
 0x169   : > { %v385_v62 = vadd.f32 %v384_v61, %v291_v54  ;;  %v1405_v63 = vpop.f32.mrb[5].mxu1 }
 0x16a   : > { %v387_v6 = vpop.f32.mrb[6].mxu1 }
 0x16b   : > { %v343_v0 = vpop.f32.mrb[4].mxu0  ;;  %v1406_v1 = vpop.f32.mrb[7].mxu1 }
 0x16c   : > { %v344_v2 = vadd.f32 %v343_v0, %v250_v57  ;;  %v345_v4 = vpop.f32.mrb[5].mxu0 }
 0x16d   : > { %v346_v5 = vadd.f32 %v345_v4, %v252_v59  ;;  %v347_v7 = vpop.f32.mrb[6].mxu0 }
 0x16e   : > { %v348_v8 = vpop.f32.mrb[7].mxu0 }
 0x170   : > { %v506_v9 = vpop.f32.mrb[8].mxu1 }
 0x171   : > { %v514_v10 = vadd.f32 %v506_v9, %v385_v62  ;;  %v1411_v11 = vpop.f32.mrb[9].mxu1 }
 0x172   : > { %v509_v12 = vpop.f32.mrb[10].mxu1 }
 0x173   : > { %v465_v13 = vpop.f32.mrb[8].mxu0  ;;  %v1412_v14 = vpop.f32.mrb[11].mxu1 }
 0x174   : > { %v512_v15 = vadd.f32 %v465_v13, %v344_v2  ;;  %v467_v16 = vpop.f32.mrb[9].mxu0  ;;  %v1269_v12 = vpop.permute.xlu0 %1268 }
 0x175   : > { %v513_v17 = vadd.f32 %v467_v16, %v346_v5  ;;  %v469_v18 = vpop.f32.mrb[10].mxu0 }
 0x176   : > { %v470_v19 = vpop.f32.mrb[11].mxu0 }
 0x178   : > { %v631_v20 = vpop.f32.mrb[12].mxu1 }
 0x179   : > { %v639_v21 = vadd.f32 %v631_v20, %v514_v10  ;;  %v1417_v22 = vpop.f32.mrb[13].mxu1 }
 0x17a   : > { %v634_v23 = vpop.f32.mrb[14].mxu1 }
 0x17b   : > { %v590_v24 = vpop.f32.mrb[12].mxu0  ;;  %v1418_v25 = vpop.f32.mrb[15].mxu1 }
 0x17c   : > { %v637_v26 = vadd.f32 %v590_v24, %v512_v15  ;;  %v592_v27 = vpop.f32.mrb[13].mxu0 }
 0x17d   : > { %v638_v28 = vadd.f32 %v592_v27, %v513_v17  ;;  %v594_v29 = vpop.f32.mrb[14].mxu0 }
 0x17e   : > { %v595_v30 = vpop.f32.mrb[15].mxu0 }
 0x180   : > { %v756_v31 = vpop.f32.mrb[16].mxu1 }
 0x181   : > { %v764_v32 = vadd.f32 %v756_v31, %v639_v21  ;;  %v1423_v33 = vpop.f32.mrb[17].mxu1 }
 0x182   : > { %v759_v34 = vpop.f32.mrb[18].mxu1 }
 0x183   : > { %v715_v35 = vpop.f32.mrb[16].mxu0  ;;  %v1424_v36 = vpop.f32.mrb[19].mxu1 }
 0x184   : > { %v762_v37 = vadd.f32 %v715_v35, %v637_v26  ;;  %v717_v38 = vpop.f32.mrb[17].mxu0 }
 0x185   : > { %v763_v39 = vadd.f32 %v717_v38, %v638_v28  ;;  %v719_v40 = vpop.f32.mrb[18].mxu0 }
 0x186   : > { %v720_v41 = vpop.f32.mrb[19].mxu0 }
 0x188   : > { %v881_v42 = vpop.f32.mrb[20].mxu1 }
 0x189   : > { %v889_v43 = vadd.f32 %v881_v42, %v764_v32  ;;  %v1429_v44 = vpop.f32.mrb[21].mxu1 }
 0x18a   : > { %v884_v45 = vpop.f32.mrb[22].mxu1 }
 0x18b   : > { %v840_v46 = vpop.f32.mrb[20].mxu0  ;;  %v1430_v47 = vpop.f32.mrb[23].mxu1 }
 0x18c   : > { %v887_v48 = vadd.f32 %v840_v46, %v762_v37  ;;  %v842_v49 = vpop.f32.mrb[21].mxu0 }
 0x18d   : > { %v888_v50 = vadd.f32 %v842_v49, %v763_v39  ;;  %v844_v51 = vpop.f32.mrb[22].mxu0 }
 0x18e   : > { %v845_v52 = vpop.f32.mrb[23].mxu0 }
 0x190   : > { %v1006_v53 = vpop.f32.mrb[24].mxu1 }
 0x191   : > { %v1014_v54 = vadd.f32 %v1006_v53, %v889_v43  ;;  %v1435_v55 = vpop.f32.mrb[25].mxu1 }
 0x192   : > { %v1009_v56 = vpop.f32.mrb[26].mxu1 }
 0x193   : > { %v965_v57 = vpop.f32.mrb[24].mxu0  ;;  %v1436_v58 = vpop.f32.mrb[27].mxu1 }
 0x194   : > { %v1012_v59 = vadd.f32 %v965_v57, %v887_v48  ;;  %v967_v3 = vpop.f32.mrb[25].mxu0 }
 0x195   : > { %v1013_v60 = vadd.f32 %v967_v3, %v888_v50  ;;  %v969_v61 = vpop.f32.mrb[26].mxu0 }
 0x196   : > { %v970_v62 = vpop.f32.mrb[27].mxu0 }
 0x198   : > { %v1131_v63 = vpop.f32.mrb[28].mxu1 }
 0x199   : > { %v1139_v6 = vadd.f32 %v1131_v63, %v1014_v54  ;;  %v1441_v0 = vpop.f32.mrb[29].mxu1 }
 0x19a   : > { %v1134_v1 = vpop.f32.mrb[30].mxu1 }
 0x19b   : > { %v1090_v2 = vpop.f32.mrb[28].mxu0  ;;  %v1442_v4 = vpop.f32.mrb[31].mxu1 }
 0x19c   : > { %v1137_v5 = vadd.f32 %v1090_v2, %v1012_v59  ;;  %v1092_v7 = vpop.f32.mrb[29].mxu0 }
 0x19d   : > { %v1138_v8 = vadd.f32 %v1092_v7, %v1013_v60  ;;  %v1094_v9 = vpop.f32.mrb[30].mxu0 }
 0x19e   : > { %v1095_v10 = vpop.f32.mrb[31].mxu0 }
 0x1a0   : > { %v1256_v11 = vpop.f32.mrb[32].mxu1 }
 0x1a1   : > { %v1264_v13 = vadd.f32 %v1256_v11, %v1139_v6  ;;  %v1447_v14 = vpop.f32.mrb[33].mxu1 }
 0x1a2   : > { %v1259_v15 = vpop.f32.mrb[34].mxu1 }
 0x1a3   : > { %v1273_v16 = vadd.f32 %v1269_v12, %v1264_v13  ;;  %v1215_v17 = vpop.f32.mrb[32].mxu0  ;;  %v1448_v18 = vpop.f32.mrb[35].mxu1 }
 0x1a4   : > { %v1262_v19 = vadd.f32 %v1215_v17, %v1137_v5  ;;  %v1217_v20 = vpop.f32.mrb[33].mxu0 }
 0x1a5   : > { %1277 = vst.msk [vmem:[%s170_s24 + $0x10] sm:$0xff] %vm1276_vm11, %v1273_v16  ;;  %v1263_v21 = vadd.f32 %v1217_v20, %v1138_v8  ;;  %v1219_v22 = vpop.f32.mrb[34].mxu0 }
 0x1a6   : > { %v1271_v23 = vadd.f32 %v1269_v12, %v1262_v19  ;;  %v1220_v24 = vpop.f32.mrb[35].mxu0 }
 0x1a7   : > { %v1272_v25 = vadd.f32 %v1269_v12, %v1263_v21 }
 0x1a8   : > { %1274 = vst [vmem:[%s170_s24] sm:$0xff] %v1271_v23 }
 0x1a9   : > { %1275 = vst [vmem:[%s170_s24 + $0x8] sm:$0xff] %v1272_v25 }
 0x1aa PF: > { %s13_s12 = sadd.s32 1, %s1486_s12  }
 0x1ab   : > { %p10_p4 = scmp.ge.s32.totalorder %s13_s12, 4  }
 0x1ad   :  { %12 = sbr.rel (!%p10_p4) target bundleno = 1 (0x1), region = 70 }

</bundles_post_ra>
